<compile_context>
chip_gen: v5e
topology: v5e:2x2
jax: 0.10.0
libtpu: 0.0.40
codegen_flags: <defaults>
</compile_context>

<pallas_src>
import math

import jax
import jax.numpy as jnp
from jax.experimental import pallas as pl
from jax.experimental.pallas import tpu as pltpu

EPS = 1e-6

_MAX_BLOCK_ROWS = 4096
_MIB = 1024 * 1024


def _rmsnorm_kernel(x_ref, w_ref, o_ref):
    # x_ref: (block_rows, D), w_ref: (1, D) f32, o_ref: (block_rows, D)
    # Load x_ref twice instead of binding a single f32 copy: keeps the
    # block_rows x D f32 temp from being live across the reduction (VMEM/vreg
    # pressure); re-loading from VMEM is free for this HBM-bound kernel.
    ss = jnp.sum(x_ref[...].astype(jnp.float32) ** 2, axis=-1, keepdims=True)
    inv = jax.lax.rsqrt(ss + EPS)                    # EUP rsqrt (frees VALU slots)
    o_ref[...] = (x_ref[...].astype(jnp.float32) * w_ref[...] * inv).astype(o_ref.dtype)


def _tpu_budgets():
    """(tile_bytes, vmem_limit_bytes, num_tensorcores) — generation aware."""
    tile_bytes = 8 * _MIB          # v5e / v6e: 128 MiB VMEM per TC
    vmem_limit = 64 * _MIB
    num_cores = 1
    try:
        vmem_cap = int(pltpu.get_tpu_info().vmem_capacity_bytes)
        if vmem_cap <= 64 * _MIB:  # v7x: 64 MiB VMEM per TC -> smaller tiles, headroom
            tile_bytes = 4 * _MIB
            vmem_limit = 48 * _MIB
    except Exception:
        pass
    try:
        kind = jax.devices()[0].device_kind.lower()
        if "v7" in kind:
            num_cores = 2
    except Exception:
        pass
    return tile_bytes, vmem_limit, num_cores


def _choose_block_rows(rows, d_model, itemsize, tile_bytes, num_cores):
    # Sublane packing: 32 rows/vreg for 1-byte dtypes, 16 for bf16, 8 for f32.
    if itemsize == 1:
        mult = 32
    elif itemsize == 2:
        mult = 16
    else:
        mult = 8

    br = tile_bytes // max(1, d_model * itemsize)
    br = min(br, _MAX_BLOCK_ROWS)
    # Never make the block (much) larger than the actual row count.
    rows_rounded = ((rows + mult - 1) // mult) * mult
    br = min(br, rows_rounded)
    br = max(mult, (br // mult) * mult)

    # On 2-TC chips, nudge the grid-step count to a multiple of num_cores so
    # the "parallel" axis splits evenly.  On 1-TC chips keep one big tile.
    if num_cores >= 2 and rows > br:
        steps = -(-rows // br)
        if steps % num_cores != 0:
            target = ((steps + num_cores - 1) // num_cores) * num_cores
            br = -(-rows // target)
            br = max(mult, ((br + mult - 1) // mult) * mult)
    return br


def rmsnorm_pallas(x, weight, *, block_rows=None):
    """x: (..., d_model), weight: (d_model,). Returns same shape/dtype as x."""
    orig_shape = x.shape
    d_model = orig_shape[-1]
    rows = int(math.prod(orig_shape[:-1])) if len(orig_shape) > 1 else 1

    x2 = x.reshape(rows, d_model)
    w2 = weight.reshape(1, d_model).astype(jnp.float32)

    itemsize = jnp.dtype(x.dtype).itemsize
    tile_bytes, vmem_limit, num_cores = _tpu_budgets()
    if block_rows is None:
        block_rows = _choose_block_rows(rows, d_model, itemsize, tile_bytes, num_cores)

    # Ragged tail handled by Pallas: OOB input rows are garbage but only feed
    # their own (never-stored) output rows; OOB output rows are masked on store.
    grid = (pl.cdiv(rows, block_rows),)

    cost = pl.CostEstimate(
        flops=3 * rows * d_model,
        transcendentals=rows,
        bytes_accessed=2 * rows * d_model * itemsize + d_model * 4,
    )

    # TODO(synk): for d_model < 128 the output is lane-sparse (masked vst);
    # folding rows into the lane dim would need a segmented reduction — only
    # worth it if tiny d_model is a real production shape.
    out = pl.pallas_call(
        _rmsnorm_kernel,
        out_shape=jax.ShapeDtypeStruct((rows, d_model), x.dtype),
        grid_spec=pltpu.PrefetchScalarGridSpec(
            num_scalar_prefetch=0,
            grid=grid,
            in_specs=[
                pl.BlockSpec((block_rows, d_model), lambda i: (i, 0)),
                pl.BlockSpec((1, d_model), lambda i: (0, 0)),  # invariant weight block
            ],
            out_specs=pl.BlockSpec((block_rows, d_model), lambda i: (i, 0)),
        ),
        compiler_params=pltpu.CompilerParams(
            dimension_semantics=("parallel",),
            vmem_limit_bytes=vmem_limit,
        ),
        cost_estimate=cost,
    )(x2, w2)

    return out.reshape(orig_shape)


def rmsnorm_ref(x, weight):
    # Pure-JAX reference reproducing the PyTorch forward exactly.
    xf = x.astype(jnp.float32)
    norm = jnp.sqrt(jnp.sum(xf * xf, axis=-1, keepdims=True))
    rms = jnp.sqrt(jnp.mean(norm**2, axis=-1, keepdims=True) + EPS)
    return (weight.astype(jnp.float32) * xf / rms).astype(x.dtype)


if __name__ == "__main__":
    key = jax.random.PRNGKey(0)
    batch, seq, d_model = 2, 8, 32

    x = jax.random.normal(key, (batch, seq, d_model), dtype=jnp.float32)
    # Deterministic parameter init: nn.Parameter(torch.ones(d_model))
    weight = jnp.ones((d_model,), dtype=jnp.float32)

    out = rmsnorm_pallas(x, weight)
    out = jax.block_until_ready(out)

    ref = rmsnorm_ref(x, weight)
    assert out.shape == x.shape and out.dtype == x.dtype
    assert jnp.allclose(out, ref, atol=1e-5, rtol=1e-5), "mismatch vs reference"

    # Non-divisible row count exercises the ragged-tail (masked-store) path.
    x_odd = jax.random.normal(jax.random.PRNGKey(1), (3, 7, d_model), dtype=jnp.float32)
    out_odd = jax.block_until_ready(rmsnorm_pallas(x_odd, weight))
    assert jnp.allclose(out_odd, rmsnorm_ref(x_odd, weight), atol=1e-5, rtol=1e-5)

    # Multi-block path (rows > block_rows) with a forced small block size.
    x_big = jax.random.normal(jax.random.PRNGKey(2), (4, 50, d_model), dtype=jnp.float32)
    out_big = jax.block_until_ready(rmsnorm_pallas(x_big, weight, block_rows=64))
    assert jnp.allclose(out_big, rmsnorm_ref(x_big, weight), atol=1e-5, rtol=1e-5)

    print("KERNEL_OK")
</pallas_src>

<mosaic_0001>
module attributes {stable_mosaic.version = 11 : i64} {
  func.func @_rmsnorm_kernel(%arg0: i32, %arg1: memref<16x32xf32, #tpu.memory_space<vmem>>, %arg2: memref<1x32xf32, #tpu.memory_space<vmem>>, %arg3: memref<16x32xf32, #tpu.memory_space<vmem>>) attributes {dimension_semantics = [#tpu.dimension_semantics<parallel>], iteration_bounds = array<i64: 1>, scalar_prefetch = 0 : i64, scratch_operands = 0 : i64, tpu.core_type = #tpu.core_type<tc>, window_params = [{transform_indices = @transform_0, window_bounds = array<i64: 16, 32>}, {pipeline_mode = #tpu.pipeline_mode<synchronous>, transform_indices = @transform_1, window_bounds = array<i64: 1, 32>}, {transform_indices = @transform_2, window_bounds = array<i64: 16, 32>}]} {
    %c0 = arith.constant 0 : index
    %c0_0 = arith.constant 0 : index
    %0 = vector.load %arg1[%c0, %c0_0] : memref<16x32xf32, #tpu.memory_space<vmem>>, vector<16x32xf32>
    %1 = arith.mulf %0, %0 : vector<16x32xf32>
    %cst = arith.constant dense<0.000000e+00> : vector<16xf32>
    %2 = vector.multi_reduction <add>, %1, %cst [1] : vector<16x32xf32> to vector<16xf32>
    %3 = vector.shape_cast %2 : vector<16xf32> to vector<16x1xf32>
    %cst_1 = arith.constant 9.99999997E-7 : f32
    %4 = vector.broadcast %cst_1 : f32 to vector<16x1xf32>
    %5 = arith.addf %3, %4 : vector<16x1xf32>
    %6 = math.rsqrt %5 : vector<16x1xf32>
    %c0_2 = arith.constant 0 : index
    %c0_3 = arith.constant 0 : index
    %7 = vector.load %arg1[%c0_2, %c0_3] : memref<16x32xf32, #tpu.memory_space<vmem>>, vector<16x32xf32>
    %c0_4 = arith.constant 0 : index
    %c0_5 = arith.constant 0 : index
    %8 = vector.load %arg2[%c0_4, %c0_5] : memref<1x32xf32, #tpu.memory_space<vmem>>, vector<1x32xf32>
    %9 = vector.broadcast %8 : vector<1x32xf32> to vector<16x32xf32>
    %10 = arith.mulf %7, %9 : vector<16x32xf32>
    %11 = vector.broadcast %6 : vector<16x1xf32> to vector<16x32xf32>
    %12 = arith.mulf %10, %11 : vector<16x32xf32>
    %c0_6 = arith.constant 0 : index
    %c0_7 = arith.constant 0 : index
    %13 = vector.load %arg3[%c0_6, %c0_7] : memref<16x32xf32, #tpu.memory_space<vmem>>, vector<16x32xf32>
    tpu.vector_store %arg3[%c0_6, %c0_7], %12 {strides = array<i32>} : memref<16x32xf32, #tpu.memory_space<vmem>>, vector<16x32xf32>,
    return
  }
  func.func @transform_0(%arg0: i32) -> (i32, i32) {
    %c0_i32 = arith.constant 0 : i32
    %c0_i32_0 = arith.constant 0 : i32
    return %arg0, %c0_i32 : i32, i32
  }
  func.func @transform_1(%arg0: i32) -> (i32, i32) {
    %c0_i32 = arith.constant 0 : i32
    %c0_i32_0 = arith.constant 0 : i32
    %c0_i32_1 = arith.constant 0 : i32
    return %c0_i32, %c0_i32_0 : i32, i32
  }
  func.func @transform_2(%arg0: i32) -> (i32, i32) {
    %c0_i32 = arith.constant 0 : i32
    %c0_i32_0 = arith.constant 0 : i32
    return %arg0, %c0_i32 : i32, i32
  }
}

</mosaic_0001>

<bundles_post_ra>
// kernel: tpu_custom_call.1
= control target key start
LH: loop header
LB: loop body
LE: loop exit
PB: predicated region body
PF: predicated region fallthrough
CT: control target
= control target key end

     0   :  { %7 = vsyncpa [#allocation3], 0  ;;  %s232_s0 = inlined_call_operand.hbm [shape: f32[16,32], index: 0, kind: input, shape index: {}]   ;;  %s233_s1 = inlined_call_operand.hbm [shape: f32[1,32], index: 1, kind: input, shape index: {}]   ;;  %s234_s2 = inlined_call_operand.hbm [shape: f32[16,32], index: 2, kind: output, shape index: {}]  }
   0x1   :  { %8 = vsyncpa [#allocation6], 0 }
   0x2   :  { %9 = vsyncpa [#allocation4], 0  ;;  %s14_s11 = sshll.u32 %s232_s0, 4  ;;  %s193_s12 = smov [#allocation2]   ;;  %s15_s11 = int_to_ptr.hbm [resolvable:$true] %s14_s11 }
   0x3   :  { %s16_s13 = sshll.u32 %s193_s12, 4  ;;  %s28_s16 = sshll.u32 %s233_s1, 4  ;;  %s17_s13 = int_to_ptr.vmem [resolvable:$true] %s16_s13  ;;  %s29_s16 = int_to_ptr.hbm [resolvable:$true] %s28_s16 }
   0x4   :  { %s194_s17 = smov 128   ;;  %s195_s18 = smov 8  }
   0x5   :  { %22 = dma.hbm_to_vmem [thread:$0]  %s15_s11, 256, %s17_s13, [#allocation3], %s194_s17, %s194_s17, %s195_s18  }
   0x6   :  { %s196_s19 = smov [#allocation5]  }
   0x7   :  { %s30_s20 = sshll.u32 %s196_s19, 4  ;;  %s31_s20 = int_to_ptr.vmem [resolvable:$true] %s30_s20 }
   0x8   :  { %33 = dma.hbm_to_vmem [thread:$0]  %s29_s16, 16, %s31_s20, [#allocation6]  }
   0x9   :  { %187 = dma.done.wait [#allocation3], 256  }
   0xa   :  { %188 = vsyncadd [#allocation3], 4294967040 }
   0xb   :  { %189 = dma.done.wait [#allocation6], 16  }
   0xc   :  { %190 = vsyncadd [#allocation6], 4294967280  ;;  %v42_v0 = vld [vmem:[#allocation2] sm:$0xff]  ;;  %vm46_vm0 = vcmask 261120   ;;  %v43_v2 = vld [vmem:[#allocation2 + $0x8] sm:$0xff]  ;;  %s197_s0 = smov [#allocation7]  }
   0xd   :  { %v44_v1 = vmul.f32 %v42_v0, %v42_v0  ;;  %v45_v4 = vmul.f32 %v43_v2, %v43_v2  ;;  %v110_v13 = vld [vmem:[#allocation5] ss:$0 sm:$0xff]  ;;  %s89_s1 = sshll.u32 %s197_s0, 4  ;;  %s91_s23 = sshll.u32 %s234_s2, 4  ;;  %s90_s1 = int_to_ptr.vmem [resolvable:$true] %s89_s1  ;;  %s92_s23 = int_to_ptr.hbm [resolvable:$true] %s91_s23 }
   0xe   :  { %v79_v17 = vmul.f32 %v110_v13, %v42_v0  ;;  %v80_v25 = vmul.f32 %v110_v13, %v43_v2 }
   0xf   :  { %v47_v3 = vsel %vm46_vm0, %v44_v1, 0.0  ;;  %v50_v5 = vsel %vm46_vm0, %v45_v4, 0.0 }
  0x10   :  { %48 = vadd.xlane.f32.xlu0 %v47_v3 }
  0x18   :  { %51 = vadd.xlane.f32.xlu0 %v50_v5 }
  0x83   :  { %v49_v6 = vpop.xlane.xlu0 %48 }
  0x84   :  { %v53_v7 = vadd.f32 1e-06, %v49_v6 }
  0x86   :  { %111 = vrsqrt.f32 %v53_v7  ;;  %vm61_vm2 = vweird.f32 %v53_v7 }
  0x8b   :  { %v52_v8 = vpop.xlane.xlu0 %51 }
  0x8c   :  { %v112_v9 = vpop.eup %111  ;;  %v54_v10 = vadd.f32 1e-06, %v52_v8 }
  0x8d   :  { %v56_v11 = vmul.f32 %v112_v9, %v53_v7  ;;  %vm62_vm1 = vweird.f32 %v112_v9 }
  0x8e   :  { %113 = vrsqrt.f32 %v54_v10  ;;  %vm63_vm3 = vmor %vm61_vm2, %vm62_vm1  ;;  %vm71_vm5 = vweird.f32 %v54_v10 }
  0x8f   :  { %v57_v12 = vmul.f32 %v112_v9, %v56_v11 }
  0x91   :  { %v58_v14 = vmul.f32 0.5, %v57_v12 }
  0x93   :  { %v59_v15 = vsub.f32 1.5, %v58_v14 }
  0x94   :  { %v114_v16 = vpop.eup %113 }
  0x95   :  { %v60_v18 = vmul.f32 %v112_v9, %v59_v15  ;;  %v66_v19 = vmul.f32 %v114_v16, %v54_v10  ;;  %vm72_vm4 = vweird.f32 %v114_v16 }
  0x96   :  { %vm73_vm6 = vmor %vm71_vm5, %vm72_vm4 }
  0x97   :  { %v64_v20 = vsel %vm63_vm3, %v112_v9, %v60_v18  ;;  %v67_v21 = vmul.f32 %v114_v16, %v66_v19 }
  0x98   :  { %v81_v22 = vmul.f32 %v79_v17, %v64_v20 }
  0x99   :  { %v68_v23 = vmul.f32 0.5, %v67_v21 }
  0x9a   :  { %83 = vst.msk [vmem:[#allocation7] sm:$0xff] %vm46_vm0, %v81_v22 }
  0x9b   :  { %v69_v24 = vsub.f32 1.5, %v68_v23 }
  0x9d   :  { %v70_v26 = vmul.f32 %v114_v16, %v69_v24 }
  0x9f   :  { %v74_v27 = vsel %vm73_vm6, %v114_v16, %v70_v26 }
  0xa0   :  { %v82_v28 = vmul.f32 %v80_v25, %v74_v27 }
  0xa2   :  { %84 = vst.msk [vmem:[#allocation7 + $0x8] sm:$0xff] %vm46_vm0, %v82_v28 }
  0xa3   :  { %97 = dma.vmem_to_hbm [thread:$0]  %s90_s1, 256, %s92_s23, [#allocation4], %s194_s17, %s194_s17, %s195_s18  }
  0xa4   :  { %191 = dma.done.wait [#allocation4], 256  }
  0xa5   :  { %192 = vsyncadd [#allocation4], 4294967040 }
  0xa6   :  { %102 = vsyncpa [#allocation3], 1 }
  0xa7   :  { %103 = vsyncpa [#allocation6], 1 }
  0xa8   :  { %104 = vsyncpa [#allocation4], 1 }

</bundles_post_ra>
